<compile_context>
chip_gen: v7x
topology: tpu7x:2x2x1
jax: 0.10.0
libtpu: 0.0.40
codegen_flags: <defaults>
</compile_context>

<pallas_src>
import functools

import jax
import jax.numpy as jnp
from jax import lax
from jax.experimental import pallas as pl
from jax.experimental.pallas import tpu as pltpu


def _dice_kernel(pred_ref, tgt_ref, inter_ref, psum_ref, tsum_ref, *,
                 num_classes, ignore_index, hw, tile_r, blocks_per_split,
                 need_pixmask):
    # pred_ref : (BT, C, TR, 128) logits (original dtype)
    # tgt_ref  : (BT, 1, TR, 128) int8/int32 labels
    # outputs  : (BT, C, 1, 128)  f32 accumulators, VMEM-resident across h
    h = pl.program_id(2)

    @pl.when(h == 0)
    def _init():
        inter_ref[...] = jnp.zeros_like(inter_ref)
        psum_ref[...] = jnp.zeros_like(psum_ref)
        tsum_ref[...] = jnp.zeros_like(tsum_ref)

    x = pred_ref[...].astype(jnp.float32)          # (BT, C, TR, 128)
    # int8 in HBM (4x less target traffic); widen once in VMEM so class
    # compares produce masks already in the f32-native (8,128) layout.
    t = tgt_ref[...].astype(jnp.int32)             # (BT, 1, TR, 128)

    # numerically stable per-pixel softmax over the (major) class axis:
    # max/sub/exp/add across C 2-D slabs is pure elementwise VALU/EUP work.
    m = jnp.max(x, axis=1, keepdims=True)          # (BT, 1, TR, 128)
    e = jnp.exp(x - m)
    s = jnp.sum(e, axis=1, keepdims=True)
    inv = pl.reciprocal(s, approx=False)           # one reciprocal per pixel

    if ignore_index is not None:
        ign = t != ignore_index
        inv = inv * ign.astype(jnp.float32)        # pred*mask: 1 op per pixel
        t = jnp.where(ign, t, 0)                   # target*mask: ignored -> 0

    # pixel-existence mask covering (a) the <=127-pixel pad up to a multiple
    # of 128 lanes and (b) the undefined rows of a ragged last spatial block.
    pixmask = None
    if need_pixmask:
        row = lax.broadcasted_iota(jnp.int32, (1, 1, tile_r, 128), 2)
        lane = lax.broadcasted_iota(jnp.int32, (1, 1, tile_r, 128), 3)
        blk = pl.program_id(1) * blocks_per_split + h
        pix = (blk * tile_r + row) * 128 + lane
        pixmask = pix < hw

    # static per-class loop: no materialized (BT, C, TR, 128) one-hot slab.
    inter_p, psum_p, tsum_p = [], [], []
    for c in range(num_classes):
        p_c = e[:, c:c + 1] * inv                  # (BT, 1, TR, 128)
        oh_c = t == c
        if pixmask is not None:
            p_c = jnp.where(pixmask, p_c, 0.0)     # select: garbage/NaN safe
            oh_c = jnp.logical_and(oh_c, pixmask)
        inter_p.append(jnp.sum(jnp.where(oh_c, p_c, 0.0), axis=2, keepdims=True))
        psum_p.append(jnp.sum(p_c, axis=2, keepdims=True))
        tsum_p.append(jnp.sum(oh_c.astype(jnp.float32), axis=2, keepdims=True))

    inter_ref[...] += jnp.concatenate(inter_p, axis=1)   # (BT, C, 1, 128)
    psum_ref[...] += jnp.concatenate(psum_p, axis=1)
    tsum_ref[...] += jnp.concatenate(tsum_p, axis=1)


def dice_loss(pred, target, *, smooth=1.0, ignore_index=None,
              max_rows_per_step=None):
    """pred: (B, C, H, W) float logits; target: (B, H, W) int. Returns scalar."""
    B, C, H, W = pred.shape
    HW = H * W
    r0 = -(-HW // 128)                              # 128-lane rows holding HW px

    # ---- hardware-aware VMEM budgets ---------------------------------------
    try:
        vmem_cap = pltpu.get_tpu_info().vmem_capacity_bytes
    except Exception:                               # noqa: BLE001 - be portable
        vmem_cap = 64 * 1024 * 1024                 # conservative (v7x-sized)
    vmem_limit = min(64 * 1024 * 1024, (vmem_cap * 3) // 4)   # 48 MiB on v7x
    budget = (vmem_limit * 3) // 4                  # pipelining headroom

    pred_isize = pred.dtype.itemsize

    # target dtype: int8 when every compared value fits -> 4x less HBM traffic
    vals = [C - 1, 0]
    if ignore_index is not None:
        vals.append(int(ignore_index))
    tgt_dtype = jnp.int8 if (max(vals) <= 127 and min(vals) >= -128) else jnp.int32
    tgt_isize = jnp.dtype(tgt_dtype).itemsize

    def step_bytes(bt_, tr_):
        slab = bt_ * C * tr_ * 128
        tgt = bt_ * tr_ * 128
        return 2 * (slab * pred_isize + tgt * tgt_isize) + 3 * slab * 4

    # ---- batch folding (only helps small images); keep >=2 parallel iters --
    max_bt = 1 if B == 1 else B // 2
    bt = 1
    for d in range(1, B + 1):
        if B % d == 0 and d <= max_bt and step_bytes(d, min(r0, 1024)) <= budget:
            bt = d

    # ---- spatial tile: as large as the VMEM budget allows ------------------
    row_cap = 4096
    if max_rows_per_step is not None:
        row_cap = max(8, (int(max_rows_per_step) // 8) * 8)
    tile_cap = 8
    while tile_cap * 2 <= row_cap and step_bytes(bt, tile_cap * 2) <= budget:
        tile_cap *= 2

    if r0 <= tile_cap:
        tile_r, nb = r0, 1
    else:
        nb = -(-r0 // tile_cap)
        tile_r = ((-(-r0 // nb) + 7) // 8) * 8
        nb = -(-r0 // tile_r)
    ragged = nb * tile_r != r0

    # ---- spatial split: give the 2nd TensorCore work when B // bt == 1 -----
    split, n_h = 1, nb
    if B // bt == 1 and nb >= 2 and nb % 2 == 0:
        split, n_h = 2, nb // 2
    assert split == 1 or bt == 1

    need_pixmask = ragged or (r0 * 128 != HW)

    # ---- layout: pad only to the next multiple of 128 lanes ----------------
    pred_f = pred.reshape(B, C, HW)                 # keep original dtype
    tgt_f = target.reshape(B, 1, HW).astype(tgt_dtype)
    pad = r0 * 128 - HW
    if pad:
        pred_f = jnp.pad(pred_f, ((0, 0), (0, 0), (0, pad)))
        tgt_f = jnp.pad(tgt_f, ((0, 0), (0, 0), (0, pad)))
    pred_f = pred_f.reshape(B, C, r0, 128)
    tgt_f = tgt_f.reshape(B, 1, r0, 128)

    kernel = functools.partial(
        _dice_kernel, num_classes=C, ignore_index=ignore_index, hw=HW,
        tile_r=tile_r, blocks_per_split=n_h, need_pixmask=need_pixmask)

    acc_shape = jax.ShapeDtypeStruct((B * split, C, 1, 128), jnp.float32)
    acc_spec = pl.BlockSpec((bt, C, 1, 128),
                            lambda b, sp, h: (b * split + sp, 0, 0, 0))

    inter, psum, tsum = pl.pallas_call(
        kernel,
        out_shape=(acc_shape, acc_shape, acc_shape),
        grid_spec=pltpu.PrefetchScalarGridSpec(
            num_scalar_prefetch=0,
            grid=(B // bt, split, n_h),
            in_specs=[
                pl.BlockSpec((bt, C, tile_r, 128),
                             lambda b, sp, h: (b, 0, sp * n_h + h, 0)),
                pl.BlockSpec((bt, 1, tile_r, 128),
                             lambda b, sp, h: (b, 0, sp * n_h + h, 0)),
            ],
            out_specs=[acc_spec, acc_spec, acc_spec],
        ),
        compiler_params=pltpu.CompilerParams(
            dimension_semantics=("parallel", "parallel", "arbitrary"),
            vmem_limit_bytes=vmem_limit),
    )(pred_f, tgt_f)

    inter = inter.reshape(B, split, C, 128).sum(axis=(1, 3))    # (B, C)
    p_sum = psum.reshape(B, split, C, 128).sum(axis=(1, 3))
    t_sum = tsum.reshape(B, split, C, 128).sum(axis=(1, 3))
    dice = (2.0 * inter + smooth) / (p_sum + t_sum + smooth)
    # 1 - (sum_c dice).mean_b / C  ==  1 - mean over (b, c)
    return 1.0 - jnp.mean(dice)


def _dice_loss_ref(pred, target, *, smooth=1.0, ignore_index=None):
    """Pure-JAX reference mirroring the PyTorch forward, for validation."""
    p = jax.nn.softmax(pred.astype(jnp.float32), axis=1)
    C = pred.shape[1]
    t = target.astype(jnp.int32)
    if ignore_index is not None:
        mask = (t != ignore_index)
        t = t * mask
        p = p * mask[:, None].astype(p.dtype)
    oh = jax.nn.one_hot(t, C, dtype=jnp.float32).transpose(0, 3, 1, 2)
    dice = 0.0
    for c in range(C):
        pc = p[:, c]
        tc = oh[:, c]
        inter = (pc * tc).sum(axis=(1, 2))
        union = pc.sum(axis=(1, 2)) + tc.sum(axis=(1, 2))
        dice += (2.0 * inter + smooth) / (union + smooth)
    return 1.0 - dice.mean() / C


if __name__ == "__main__":
    key = jax.random.PRNGKey(0)
    k1, k2, k3, k4, k5, k6, k7, k8 = jax.random.split(key, 8)

    # A) basic path: B=2, C=4, 16x16 (aligned, single step per batch)
    pred = jax.random.normal(k1, (2, 4, 16, 16), dtype=jnp.float32)
    target = jax.random.randint(k2, (2, 16, 16), 0, 4, dtype=jnp.int32)
    out = jax.block_until_ready(dice_loss(pred, target, smooth=1.0))
    ref = _dice_loss_ref(pred, target, smooth=1.0)
    assert jnp.allclose(out, ref, atol=1e-5, rtol=1e-5), (out, ref)

    # B) ignore_index path
    out2 = jax.block_until_ready(dice_loss(pred, target, smooth=1.0,
                                           ignore_index=0))
    ref2 = _dice_loss_ref(pred, target, smooth=1.0, ignore_index=0)
    assert jnp.allclose(out2, ref2, atol=1e-5, rtol=1e-5), (out2, ref2)

    # C) H*W not a multiple of 128 (lane-pad + in-kernel pixel mask)
    pred_c = jax.random.normal(k3, (2, 4, 12, 12), dtype=jnp.float32)
    tgt_c = jax.random.randint(k4, (2, 12, 12), 0, 4, dtype=jnp.int32)
    out3 = jax.block_until_ready(dice_loss(pred_c, tgt_c, smooth=1.0))
    ref3 = _dice_loss_ref(pred_c, tgt_c, smooth=1.0)
    assert jnp.allclose(out3, ref3, atol=1e-5, rtol=1e-5), (out3, ref3)

    # D) ragged last spatial block + multi-step accumulation (forced tiny tile)
    pred_d = jax.random.normal(k5, (2, 3, 36, 36), dtype=jnp.float32)
    tgt_d = jax.random.randint(k6, (2, 36, 36), 0, 3, dtype=jnp.int32)
    out4 = jax.block_until_ready(dice_loss(pred_d, tgt_d, smooth=1.0,
                                           ignore_index=1,
                                           max_rows_per_step=8))
    ref4 = _dice_loss_ref(pred_d, tgt_d, smooth=1.0, ignore_index=1)
    assert jnp.allclose(out4, ref4, atol=1e-5, rtol=1e-5), (out4, ref4)

    # E) B=1 spatial-split parallel axis + bf16 logits kept bf16 in HBM
    pred_e = jax.random.normal(k7, (1, 3, 32, 64), dtype=jnp.bfloat16)
    tgt_e = jax.random.randint(k8, (1, 32, 64), 0, 3, dtype=jnp.int32)
    out5 = jax.block_until_ready(dice_loss(pred_e, tgt_e, smooth=1.0,
                                           max_rows_per_step=8))
    ref5 = _dice_loss_ref(pred_e, tgt_e, smooth=1.0)
    assert jnp.allclose(out5, ref5, atol=1e-5, rtol=1e-5), (out5, ref5)

    print("KERNEL_OK")
</pallas_src>

<mosaic_0001>
module attributes {stable_mosaic.version = 11 : i64} {
  func.func @_dice_kernel(%arg0: i32, %arg1: i32, %arg2: i32, %arg3: memref<1x4x2x128xf32, #tpu.memory_space<vmem>>, %arg4: memref<1x1x2x128xi8, #tpu.memory_space<vmem>>, %arg5: memref<1x4x1x128xf32, #tpu.memory_space<vmem>>, %arg6: memref<1x4x1x128xf32, #tpu.memory_space<vmem>>, %arg7: memref<1x4x1x128xf32, #tpu.memory_space<vmem>>) attributes {dimension_semantics = [#tpu.dimension_semantics<parallel>, #tpu.dimension_semantics<parallel>, #tpu.dimension_semantics<arbitrary>], iteration_bounds = array<i64: 2, 1, 1>, scalar_prefetch = 0 : i64, scratch_operands = 0 : i64, tpu.core_type = #tpu.core_type<tc>, window_params = [{transform_indices = @transform_0, window_bounds = array<i64: 1, 4, 2, 128>}, {transform_indices = @transform_1, window_bounds = array<i64: 1, 1, 2, 128>}, {transform_indices = @transform_2, window_bounds = array<i64: 1, 4, 1, 128>}, {transform_indices = @transform_3, window_bounds = array<i64: 1, 4, 1, 128>}, {transform_indices = @transform_4, window_bounds = array<i64: 1, 4, 1, 128>}]} {
    %c0_i32 = arith.constant 0 : i32
    %0 = arith.cmpi eq, %arg2, %c0_i32 : i32
    %1 = arith.extui %0 : i1 to i32
    %c0_i32_0 = arith.constant 0 : i32
    %2 = arith.cmpi ne, %1, %c0_i32_0 : i32
    scf.if %2 {
      %cst_50 = arith.constant 0.000000e+00 : f32
      %82 = vector.broadcast %cst_50 : f32 to vector<1x4x1x128xf32>
      %c0_51 = arith.constant 0 : index
      %c0_52 = arith.constant 0 : index
      %c0_53 = arith.constant 0 : index
      %c0_54 = arith.constant 0 : index
      %83 = vector.load %arg5[%c0_51, %c0_52, %c0_53, %c0_54] : memref<1x4x1x128xf32, #tpu.memory_space<vmem>>, vector<1x4x1x128xf32>
      tpu.vector_store %arg5[%c0_51, %c0_52, %c0_53, %c0_54], %82 {strides = array<i32>} : memref<1x4x1x128xf32, #tpu.memory_space<vmem>>, vector<1x4x1x128xf32>,
      %cst_55 = arith.constant 0.000000e+00 : f32
      %84 = vector.broadcast %cst_55 : f32 to vector<1x4x1x128xf32>
      %c0_56 = arith.constant 0 : index
      %c0_57 = arith.constant 0 : index
      %c0_58 = arith.constant 0 : index
      %c0_59 = arith.constant 0 : index
      %85 = vector.load %arg6[%c0_56, %c0_57, %c0_58, %c0_59] : memref<1x4x1x128xf32, #tpu.memory_space<vmem>>, vector<1x4x1x128xf32>
      tpu.vector_store %arg6[%c0_56, %c0_57, %c0_58, %c0_59], %84 {strides = array<i32>} : memref<1x4x1x128xf32, #tpu.memory_space<vmem>>, vector<1x4x1x128xf32>,
      %cst_60 = arith.constant 0.000000e+00 : f32
      %86 = vector.broadcast %cst_60 : f32 to vector<1x4x1x128xf32>
      %c0_61 = arith.constant 0 : index
      %c0_62 = arith.constant 0 : index
      %c0_63 = arith.constant 0 : index
      %c0_64 = arith.constant 0 : index
      %87 = vector.load %arg7[%c0_61, %c0_62, %c0_63, %c0_64] : memref<1x4x1x128xf32, #tpu.memory_space<vmem>>, vector<1x4x1x128xf32>
      tpu.vector_store %arg7[%c0_61, %c0_62, %c0_63, %c0_64], %86 {strides = array<i32>} : memref<1x4x1x128xf32, #tpu.memory_space<vmem>>, vector<1x4x1x128xf32>,
    } else {
    }
    %c0 = arith.constant 0 : index
    %c0_1 = arith.constant 0 : index
    %c0_2 = arith.constant 0 : index
    %c0_3 = arith.constant 0 : index
    %3 = vector.load %arg3[%c0, %c0_1, %c0_2, %c0_3] : memref<1x4x2x128xf32, #tpu.memory_space<vmem>>, vector<1x4x2x128xf32>
    %c0_4 = arith.constant 0 : index
    %c0_5 = arith.constant 0 : index
    %c0_6 = arith.constant 0 : index
    %c0_7 = arith.constant 0 : index
    %4 = vector.load %arg4[%c0_4, %c0_5, %c0_6, %c0_7] : memref<1x1x2x128xi8, #tpu.memory_space<vmem>>, vector<1x1x2x128xi8>
    %5 = arith.extsi %4 : vector<1x1x2x128xi8> to vector<1x1x2x128xi32>
    %cst = arith.constant dense<0xFF800000> : vector<1x2x128xf32>
    %6 = vector.multi_reduction <maximumf>, %3, %cst [1] : vector<1x4x2x128xf32> to vector<1x2x128xf32>
    %7 = vector.shape_cast %6 : vector<1x2x128xf32> to vector<1x1x2x128xf32>
    %8 = vector.broadcast %7 : vector<1x1x2x128xf32> to vector<1x4x2x128xf32>
    %9 = arith.subf %3, %8 : vector<1x4x2x128xf32>
    %10 = math.exp %9 : vector<1x4x2x128xf32>
    %cst_8 = arith.constant dense<0.000000e+00> : vector<1x2x128xf32>
    %11 = vector.multi_reduction <add>, %10, %cst_8 [1] : vector<1x4x2x128xf32> to vector<1x2x128xf32>
    %12 = vector.shape_cast %11 : vector<1x2x128xf32> to vector<1x1x2x128xf32>
    %13 = tpu.reciprocal %12 : vector<1x1x2x128xf32> -> vector<1x1x2x128xf32>
    %14 = vector.extract_strided_slice %10 {offsets = [0, 0, 0, 0], sizes = [1, 1, 2, 128], strides = [1, 1, 1, 1]} : vector<1x4x2x128xf32> to vector<1x1x2x128xf32>
    %15 = arith.mulf %14, %13 : vector<1x1x2x128xf32>
    %c0_i32_9 = arith.constant 0 : i32
    %16 = vector.broadcast %c0_i32_9 : i32 to vector<1x1x2x128xi32>
    %17 = arith.cmpi eq, %5, %16 : vector<1x1x2x128xi32>
    %cst_10 = arith.constant 0.000000e+00 : f32
    %18 = vector.broadcast %cst_10 : f32 to vector<1x1x2x128xf32>
    %19 = arith.select %17, %15, %18 : vector<1x1x2x128xi1>, vector<1x1x2x128xf32>
    %cst_11 = arith.constant dense<0.000000e+00> : vector<1x1x128xf32>
    %20 = vector.multi_reduction <add>, %19, %cst_11 [2] : vector<1x1x2x128xf32> to vector<1x1x128xf32>
    %21 = vector.shape_cast %20 : vector<1x1x128xf32> to vector<1x1x1x128xf32>
    %cst_12 = arith.constant dense<0.000000e+00> : vector<1x1x128xf32>
    %22 = vector.multi_reduction <add>, %15, %cst_12 [2] : vector<1x1x2x128xf32> to vector<1x1x128xf32>
    %23 = vector.shape_cast %22 : vector<1x1x128xf32> to vector<1x1x1x128xf32>
    %24 = arith.extui %17 : vector<1x1x2x128xi1> to vector<1x1x2x128xi32>
    %25 = arith.sitofp %24 : vector<1x1x2x128xi32> to vector<1x1x2x128xf32>
    %cst_13 = arith.constant dense<0.000000e+00> : vector<1x1x128xf32>
    %26 = vector.multi_reduction <add>, %25, %cst_13 [2] : vector<1x1x2x128xf32> to vector<1x1x128xf32>
    %27 = vector.shape_cast %26 : vector<1x1x128xf32> to vector<1x1x1x128xf32>
    %28 = vector.extract_strided_slice %10 {offsets = [0, 1, 0, 0], sizes = [1, 1, 2, 128], strides = [1, 1, 1, 1]} : vector<1x4x2x128xf32> to vector<1x1x2x128xf32>
    %29 = arith.mulf %28, %13 : vector<1x1x2x128xf32>
    %c1_i32 = arith.constant 1 : i32
    %30 = vector.broadcast %c1_i32 : i32 to vector<1x1x2x128xi32>
    %31 = arith.cmpi eq, %5, %30 : vector<1x1x2x128xi32>
    %cst_14 = arith.constant 0.000000e+00 : f32
    %32 = vector.broadcast %cst_14 : f32 to vector<1x1x2x128xf32>
    %33 = arith.select %31, %29, %32 : vector<1x1x2x128xi1>, vector<1x1x2x128xf32>
    %cst_15 = arith.constant dense<0.000000e+00> : vector<1x1x128xf32>
    %34 = vector.multi_reduction <add>, %33, %cst_15 [2] : vector<1x1x2x128xf32> to vector<1x1x128xf32>
    %35 = vector.shape_cast %34 : vector<1x1x128xf32> to vector<1x1x1x128xf32>
    %cst_16 = arith.constant dense<0.000000e+00> : vector<1x1x128xf32>
    %36 = vector.multi_reduction <add>, %29, %cst_16 [2] : vector<1x1x2x128xf32> to vector<1x1x128xf32>
    %37 = vector.shape_cast %36 : vector<1x1x128xf32> to vector<1x1x1x128xf32>
    %38 = arith.extui %31 : vector<1x1x2x128xi1> to vector<1x1x2x128xi32>
    %39 = arith.sitofp %38 : vector<1x1x2x128xi32> to vector<1x1x2x128xf32>
    %cst_17 = arith.constant dense<0.000000e+00> : vector<1x1x128xf32>
    %40 = vector.multi_reduction <add>, %39, %cst_17 [2] : vector<1x1x2x128xf32> to vector<1x1x128xf32>
    %41 = vector.shape_cast %40 : vector<1x1x128xf32> to vector<1x1x1x128xf32>
    %42 = vector.extract_strided_slice %10 {offsets = [0, 2, 0, 0], sizes = [1, 1, 2, 128], strides = [1, 1, 1, 1]} : vector<1x4x2x128xf32> to vector<1x1x2x128xf32>
    %43 = arith.mulf %42, %13 : vector<1x1x2x128xf32>
    %c2_i32 = arith.constant 2 : i32
    %44 = vector.broadcast %c2_i32 : i32 to vector<1x1x2x128xi32>
    %45 = arith.cmpi eq, %5, %44 : vector<1x1x2x128xi32>
    %cst_18 = arith.constant 0.000000e+00 : f32
    %46 = vector.broadcast %cst_18 : f32 to vector<1x1x2x128xf32>
    %47 = arith.select %45, %43, %46 : vector<1x1x2x128xi1>, vector<1x1x2x128xf32>
    %cst_19 = arith.constant dense<0.000000e+00> : vector<1x1x128xf32>
    %48 = vector.multi_reduction <add>, %47, %cst_19 [2] : vector<1x1x2x128xf32> to vector<1x1x128xf32>
    %49 = vector.shape_cast %48 : vector<1x1x128xf32> to vector<1x1x1x128xf32>
    %cst_20 = arith.constant dense<0.000000e+00> : vector<1x1x128xf32>
    %50 = vector.multi_reduction <add>, %43, %cst_20 [2] : vector<1x1x2x128xf32> to vector<1x1x128xf32>
    %51 = vector.shape_cast %50 : vector<1x1x128xf32> to vector<1x1x1x128xf32>
    %52 = arith.extui %45 : vector<1x1x2x128xi1> to vector<1x1x2x128xi32>
    %53 = arith.sitofp %52 : vector<1x1x2x128xi32> to vector<1x1x2x128xf32>
    %cst_21 = arith.constant dense<0.000000e+00> : vector<1x1x128xf32>
    %54 = vector.multi_reduction <add>, %53, %cst_21 [2] : vector<1x1x2x128xf32> to vector<1x1x128xf32>
    %55 = vector.shape_cast %54 : vector<1x1x128xf32> to vector<1x1x1x128xf32>
    %56 = vector.extract_strided_slice %10 {offsets = [0, 3, 0, 0], sizes = [1, 1, 2, 128], strides = [1, 1, 1, 1]} : vector<1x4x2x128xf32> to vector<1x1x2x128xf32>
    %57 = arith.mulf %56, %13 : vector<1x1x2x128xf32>
    %c3_i32 = arith.constant 3 : i32
    %58 = vector.broadcast %c3_i32 : i32 to vector<1x1x2x128xi32>
    %59 = arith.cmpi eq, %5, %58 : vector<1x1x2x128xi32>
    %cst_22 = arith.constant 0.000000e+00 : f32
    %60 = vector.broadcast %cst_22 : f32 to vector<1x1x2x128xf32>
    %61 = arith.select %59, %57, %60 : vector<1x1x2x128xi1>, vector<1x1x2x128xf32>
    %cst_23 = arith.constant dense<0.000000e+00> : vector<1x1x128xf32>
    %62 = vector.multi_reduction <add>, %61, %cst_23 [2] : vector<1x1x2x128xf32> to vector<1x1x128xf32>
    %63 = vector.shape_cast %62 : vector<1x1x128xf32> to vector<1x1x1x128xf32>
    %cst_24 = arith.constant dense<0.000000e+00> : vector<1x1x128xf32>
    %64 = vector.multi_reduction <add>, %57, %cst_24 [2] : vector<1x1x2x128xf32> to vector<1x1x128xf32>
    %65 = vector.shape_cast %64 : vector<1x1x128xf32> to vector<1x1x1x128xf32>
    %66 = arith.extui %59 : vector<1x1x2x128xi1> to vector<1x1x2x128xi32>
    %67 = arith.sitofp %66 : vector<1x1x2x128xi32> to vector<1x1x2x128xf32>
    %cst_25 = arith.constant dense<0.000000e+00> : vector<1x1x128xf32>
    %68 = vector.multi_reduction <add>, %67, %cst_25 [2] : vector<1x1x2x128xf32> to vector<1x1x128xf32>
    %69 = vector.shape_cast %68 : vector<1x1x128xf32> to vector<1x1x1x128xf32>
    %c0_26 = arith.constant 0 : index
    %c0_27 = arith.constant 0 : index
    %c0_28 = arith.constant 0 : index
    %c0_29 = arith.constant 0 : index
    %70 = vector.load %arg5[%c0_26, %c0_27, %c0_28, %c0_29] : memref<1x4x1x128xf32, #tpu.memory_space<vmem>>, vector<1x4x1x128xf32>
    %71 = tpu.concatenate %21, %35, %49, %63 in 1 : vector<1x1x1x128xf32>, vector<1x1x1x128xf32>, vector<1x1x1x128xf32>, vector<1x1x1x128xf32> -> vector<1x4x1x128xf32>
    %72 = arith.addf %70, %71 : vector<1x4x1x128xf32>
    %c0_30 = arith.constant 0 : index
    %c0_31 = arith.constant 0 : index
    %c0_32 = arith.constant 0 : index
    %c0_33 = arith.constant 0 : index
    %73 = vector.load %arg5[%c0_30, %c0_31, %c0_32, %c0_33] : memref<1x4x1x128xf32, #tpu.memory_space<vmem>>, vector<1x4x1x128xf32>
    tpu.vector_store %arg5[%c0_30, %c0_31, %c0_32, %c0_33], %72 {strides = array<i32>} : memref<1x4x1x128xf32, #tpu.memory_space<vmem>>, vector<1x4x1x128xf32>,
    %c0_34 = arith.constant 0 : index
    %c0_35 = arith.constant 0 : index
    %c0_36 = arith.constant 0 : index
    %c0_37 = arith.constant 0 : index
    %74 = vector.load %arg6[%c0_34, %c0_35, %c0_36, %c0_37] : memref<1x4x1x128xf32, #tpu.memory_space<vmem>>, vector<1x4x1x128xf32>
    %75 = tpu.concatenate %23, %37, %51, %65 in 1 : vector<1x1x1x128xf32>, vector<1x1x1x128xf32>, vector<1x1x1x128xf32>, vector<1x1x1x128xf32> -> vector<1x4x1x128xf32>
    %76 = arith.addf %74, %75 : vector<1x4x1x128xf32>
    %c0_38 = arith.constant 0 : index
    %c0_39 = arith.constant 0 : index
    %c0_40 = arith.constant 0 : index
    %c0_41 = arith.constant 0 : index
    %77 = vector.load %arg6[%c0_38, %c0_39, %c0_40, %c0_41] : memref<1x4x1x128xf32, #tpu.memory_space<vmem>>, vector<1x4x1x128xf32>
    tpu.vector_store %arg6[%c0_38, %c0_39, %c0_40, %c0_41], %76 {strides = array<i32>} : memref<1x4x1x128xf32, #tpu.memory_space<vmem>>, vector<1x4x1x128xf32>,
    %c0_42 = arith.constant 0 : index
    %c0_43 = arith.constant 0 : index
    %c0_44 = arith.constant 0 : index
    %c0_45 = arith.constant 0 : index
    %78 = vector.load %arg7[%c0_42, %c0_43, %c0_44, %c0_45] : memref<1x4x1x128xf32, #tpu.memory_space<vmem>>, vector<1x4x1x128xf32>
    %79 = tpu.concatenate %27, %41, %55, %69 in 1 : vector<1x1x1x128xf32>, vector<1x1x1x128xf32>, vector<1x1x1x128xf32>, vector<1x1x1x128xf32> -> vector<1x4x1x128xf32>
    %80 = arith.addf %78, %79 : vector<1x4x1x128xf32>
    %c0_46 = arith.constant 0 : index
    %c0_47 = arith.constant 0 : index
    %c0_48 = arith.constant 0 : index
    %c0_49 = arith.constant 0 : index
    %81 = vector.load %arg7[%c0_46, %c0_47, %c0_48, %c0_49] : memref<1x4x1x128xf32, #tpu.memory_space<vmem>>, vector<1x4x1x128xf32>
    tpu.vector_store %arg7[%c0_46, %c0_47, %c0_48, %c0_49], %80 {strides = array<i32>} : memref<1x4x1x128xf32, #tpu.memory_space<vmem>>, vector<1x4x1x128xf32>,
    return
  }
  func.func @transform_0(%arg0: i32, %arg1: i32, %arg2: i32) -> (i32, i32, i32, i32) {
    %c1_i32 = arith.constant 1 : i32
    %0 = arith.muli %arg1, %c1_i32 : i32
    %1 = arith.addi %0, %arg2 : i32
    %c0_i32 = arith.constant 0 : i32
    %c0_i32_0 = arith.constant 0 : i32
    %c0_i32_1 = arith.constant 0 : i32
    return %arg0, %c0_i32, %1, %c0_i32_0 : i32, i32, i32, i32
  }
  func.func @transform_1(%arg0: i32, %arg1: i32, %arg2: i32) -> (i32, i32, i32, i32) {
    %c1_i32 = arith.constant 1 : i32
    %0 = arith.muli %arg1, %c1_i32 : i32
    %1 = arith.addi %0, %arg2 : i32
    %c0_i32 = arith.constant 0 : i32
    %c0_i32_0 = arith.constant 0 : i32
    %c0_i32_1 = arith.constant 0 : i32
    return %arg0, %c0_i32, %1, %c0_i32_0 : i32, i32, i32, i32
  }
  func.func @transform_2(%arg0: i32, %arg1: i32, %arg2: i32) -> (i32, i32, i32, i32) {
    %c1_i32 = arith.constant 1 : i32
    %0 = arith.muli %arg0, %c1_i32 : i32
    %1 = arith.addi %0, %arg1 : i32
    %c0_i32 = arith.constant 0 : i32
    %c0_i32_0 = arith.constant 0 : i32
    %c0_i32_1 = arith.constant 0 : i32
    %c0_i32_2 = arith.constant 0 : i32
    return %1, %c0_i32, %c0_i32_0, %c0_i32_1 : i32, i32, i32, i32
  }
  func.func @transform_3(%arg0: i32, %arg1: i32, %arg2: i32) -> (i32, i32, i32, i32) {
    %c1_i32 = arith.constant 1 : i32
    %0 = arith.muli %arg0, %c1_i32 : i32
    %1 = arith.addi %0, %arg1 : i32
    %c0_i32 = arith.constant 0 : i32
    %c0_i32_0 = arith.constant 0 : i32
    %c0_i32_1 = arith.constant 0 : i32
    %c0_i32_2 = arith.constant 0 : i32
    return %1, %c0_i32, %c0_i32_0, %c0_i32_1 : i32, i32, i32, i32
  }
  func.func @transform_4(%arg0: i32, %arg1: i32, %arg2: i32) -> (i32, i32, i32, i32) {
    %c1_i32 = arith.constant 1 : i32
    %0 = arith.muli %arg0, %c1_i32 : i32
    %1 = arith.addi %0, %arg1 : i32
    %c0_i32 = arith.constant 0 : i32
    %c0_i32_0 = arith.constant 0 : i32
    %c0_i32_1 = arith.constant 0 : i32
    %c0_i32_2 = arith.constant 0 : i32
    return %1, %c0_i32, %c0_i32_0, %c0_i32_1 : i32, i32, i32, i32
  }
}

</mosaic_0001>

<bundles_post_ra>
// kernel: tpu_custom_call.1
= control target key start
LH: loop header
LB: loop body
LE: loop exit
PB: predicated region body
PF: predicated region fallthrough
CT: control target
= control target key end

     0   :  { %10 = vsyncpa [#allocation3], 0  ;;  %s1408_s0 = inlined_call_operand.hbm [shape: f32[2,4,2,128], index: 0, kind: input, shape index: {}]   ;;  %s1409_s1 = inlined_call_operand.vmem [shape: s8[2,1,2,128], index: 1, kind: input, shape index: {}]   ;;  %s1410_s2 = inlined_call_operand.hbm [shape: f32[2,4,1,128], index: 2, kind: output, shape index: {0}]   ;;  %s1411_s3 = inlined_call_operand.hbm [shape: f32[2,4,1,128], index: 3, kind: output, shape index: {1}]   ;;  %s1412_s4 = inlined_call_operand.hbm [shape: f32[2,4,1,128], index: 4, kind: output, shape index: {2}]  }
   0x1   :  { %12 = vsyncpa [#allocation3 + $0x1], 0 }
   0x2   :  { %13 = vsyncpa [#allocation4], 0 }
   0x3   :  { %15 = vsyncpa [#allocation4 + $0x1], 0 }
   0x4   :  { %16 = vsyncpa [#allocation7], 0 }
   0x5   :  { %18 = vsyncpa [#allocation7 + $0x1], 0  ;;  %s1039_s15 = smov 0   ;;  %s1041_s16 = smov 0  }
   0x6   :  { %s1043_s17 = smov 0   ;;  %s1045_s18 = smov 0  }
   0x7   :  { %s1047_s19 = smov 0   ;;  %s1049_s20 = smov 0  }
   0x8 LB: > { %s1070_s21 = sadd.s32 4294967295, %s1003_s20   ;;  %s1414_s22 = sadd.s32 4294967294, %s1003_s20   ;;  %s1003_s20 = sphi %s1049_s20, %s24_s20   ;;  %s999_s19 = sphi %s1047_s19, %s1429_s19   ;;  %s995_s18 = sphi %s1045_s18, %s1428_s18   ;;  %s991_s17 = sphi %s1043_s17, %s1427_s17   ;;  %s987_s16 = sphi %s1041_s16, %s1426_s16   ;;  %s983_s15 = sphi %s1039_s15, %s1425_s15  }
   0x9   : > { %s43_s23 = sadd.s32 1, %s999_s19  ;;  %s54_s24 = sadd.s32 1, %s991_s17 }
   0xa   : > { %p45_p0 = scmp.ge.s32.totalorder %s43_s23, 2  ;;  %p61_p1 = scmp.ne.s32.totalorder %s991_s17, %s987_s16 }
   0xb   : > { %p62_p2 = scmp.eq.s32.totalorder %s1003_s20, 0  ;;  %p67_p3 = scmp.ne.s32.totalorder %s987_s16, %s983_s15 }
   0xc   : > { %s1431_s23 = smov (%p45_p0, %s43_s23), 0  ;;  %p68_p5 = scmp.eq.s32.totalorder %s1070_s21, 0 }
   0xd   : > { %p1082_p4 = por %p62_p2, %p61_p1  ;;  %s49_s26 = ssub.s32 %s999_s19, %s1431_s23 }
   0xe   : > { %p123_p6 = scmp.eq.s32.totalorder %s1070_s21, 1  ;;  %p52_p7 = scmp.eq.s32.totalorder %s49_s26, 0 }
   0xf   : > { %p1090_p8 = por %p68_p5, %p67_p3  ;;  %p129_p10 = scmp.eq.s32.totalorder %s1414_s22, 1 }
  0x10   : > { %p1094_p9 = por %p123_p6, %p61_p1  ;;  %p766_p13 = scmp.lt.s32.totalorder %s1003_s20, 2 }
  0x11   : > { %s1101_s29 = scalar_select %p52_p7, %s991_s17, %s54_s24  }
  0x12   : > { %s1417_s28 = scalar_select %p1094_p9, 1, 0 }
  0x13   : > { %p1103_p11 = por %p129_p10, %p67_p3  ;;  %s205_s5 = sand.u32 1, %s991_s17  }
  0x14   : > { %s717_s6 = sshll.u32 %s205_s5, 3  ;;  %s740_s7 = sshll.u32 %s999_s19, 7 }
  0x15   : > { %s1418_s30 = scalar_select %p1103_p11, 1, 0 }
  0x16   : > { %s1114_s10 = scalar_lea.hbm %s1408_s0, %s740_s7  ;;  %s209_s11 = scalar_lea.vmem [#allocation2], %s717_s6 }
  0x17   : > { %s218_s12 = sshll.u32 %s209_s11, 4  ;;  %p1120_p0 = pnand %p766_p13, %p1082_p4  ;;  %s1116_s12 = int_to_ptr.vmem [resolvable:$true] %s218_s12 }
  0x18   : > { %s1125_s14 = scalar_lea.sflag [#allocation3], %s205_s5  ;;  %s831_s24 = scalar_lea.hbm %s1114_s10, 128 }
  0x19   : > { %p832_p2 = scmp.ne.s32.totalorder %s1114_s10, %s831_s24  ;;  %p833_p3 = pneg %p1120_p0 }
  0x1a   : > { %s836_s25 = scalar_lea.hbm %s1408_s0, 256  ;;  %p837_p4 = scmp.lt.u32.totalorder %s1114_s10, %s1408_s0 }
  0x1b   : > { %p834_p5 = pnand %p833_p3, %p832_p2  ;;  %p838_p7 = scmp.lt.u32.totalorder %s836_s25, %s831_s24 }
  0x1c   : > { %p840_p13 = scmp.lt.u32.totalorder %s831_s24, %s1114_s10 }
  0x1d   : > { %p835_p6 = pneg %p834_p5  ;;  %p839_p10 = por %p838_p7, %p837_p4 }
  0x1f   : > { %p841_p12 = por %p840_p13, %p839_p10 }
  0x21   : > { %p842_p1 = pnand %p841_p12, %p835_p6 }
  0x23   : > { %845 = shalt.err (!%p842_p1)
}
  0x24   : > { %s846_s5 = scalar_lea.vmem %s1116_s12, 128  ;;  %s1005_s9 = smov [#allocation2]  }
  0x25   : > { %p847_p2 = scmp.ne.s32.totalorder %s1116_s12, %s846_s5  ;;  %s851_s11 = sshll.u32 %s1005_s9, 4  ;;  %s852_s11 = int_to_ptr.vmem [resolvable:$false] %s851_s11 }
  0x26   : > { %s853_s26 = scalar_lea.vmem %s852_s11, 256  ;;  %p854_p9 = scmp.lt.s32.totalorder %s1116_s12, %s852_s11 }
  0x27   : > { %p849_p5 = pnand %p847_p2, %p833_p3  ;;  %p855_p4 = scmp.lt.s32.totalorder %s853_s26, %s846_s5 }
  0x29   : > { %p850_p11 = pneg %p849_p5  ;;  %p856_p7 = por %p855_p4, %p854_p9 }
  0x2b   : > { %p857_p10 = pnand %p856_p7, %p850_p11 }
  0x2d   : > { %860 = shalt.err (!%p857_p10)
}
  0x2e   : > { %s1006_s24 = smov 32   ;;  %s1007_s6 = smov 2  }
  0x2f   : > { %755 = dma.hbm_to_vmem [thread:$0]  (!%p1120_p0), %s1114_s10, 128, %s1116_s12, %s1125_s14, %s1006_s24, %s1006_s24, %s1007_s6  }
  0x30   : > { %p237_p12 = scmp.lt.s32.totalorder %s1003_s20, 3  ;;  %p1420_p1 = scmp.ge.s32.totalorder %s1003_s20, 1 }
  0x32   : > { %p238_p3 = pnand %p1420_p1, %p237_p12 }
  0x33   : > { %s1157_s25 = sand.u32 (!%p238_p3), 1, %s987_s16  }
  0x34   : > { %241 = sbr.rel (%p238_p3) target bundleno = 190 (0xbe), region = 28  ;;  %s721_s7 = sshll.u32 (!%p238_p3), %s1157_s25, 3 }
  0x35   : > { %s244_s8 = scalar_lea.sflag (!%p238_p3), [#allocation3], %s1157_s25  ;;  %s247_s5 = scalar_lea.vmem (!%p238_p3), [#allocation2], %s721_s7 }
  0x3b   : > { %970 = dma.done.wait (%p1090_p8), %s244_s8, 128  }
  0x3c   : > { %972 = vsyncadd (%p1090_p8), %s244_s8, 4294967168  ;;  %s722_s10 = sshll.u32 %s1157_s25, 2  ;;  %p291_p9 = scmp.lt.s32.totalorder %s995_s18, 1  ;;  %v1008_v0 = vmov 0.0   ;;  %vm323_vm0 = vcmask 1041408  }
  0x3d   : > { %s1167_s12 = scalar_lea.vmem [#allocation6], %s722_s10  ;;  %s1173_s13 = scalar_lea.vmem [#allocation5], %s722_s10  ;;  %v317_v1 = vld [vmem:[%s247_s5] sm:$0x3]  ;;  %v318_v2 = vld [vmem:[%s247_s5 + $0x2] sm:$0x3] }
  0x3e   : > { %309 = vst [vmem:[%s1167_s12] sm:$0x1] %v1008_v0  ;;  %310 = vst [vmem:[%s1167_s12 + $0x1] sm:$0x1] %v1008_v0  ;;  %s1179_s27 = scalar_lea.vmem [#allocation8], %s722_s10  ;;  %v319_v3 = vld [vmem:[%s247_s5 + $0x4] sm:$0x3] }
  0x3f   : > { %311 = vst [vmem:[%s1167_s12 + $0x2] sm:$0x1] %v1008_v0  ;;  %312 = vst [vmem:[%s1167_s12 + $0x3] sm:$0x1] %v1008_v0  ;;  %s292_s14 = scalar_select %p291_p9, %s995_s18, 1  ;;  %v324_v5 = vsel %vm323_vm0, %v317_v1, -inf }
  0x40   : > { %305 = vst [vmem:[%s1173_s13] sm:$0x1] %v1008_v0  ;;  %306 = vst [vmem:[%s1173_s13 + $0x1] sm:$0x1] %v1008_v0  ;;  %v320_v4 = vld [vmem:[%s247_s5 + $0x6] sm:$0x3]  ;;  %v325_v6 = vsel %vm323_vm0, %v318_v2, -inf }
  0x41   : > { %307 = vst [vmem:[%s1173_s13 + $0x2] sm:$0x1] %v1008_v0  ;;  %308 = vst [vmem:[%s1173_s13 + $0x3] sm:$0x1] %v1008_v0  ;;  %s296_s26 = scalar_lea.vmem %s1409_s1, %s292_s14  ;;  %v326_v7 = vsel %vm323_vm0, %v319_v3, -inf  ;;  %v327_v8 = vsel %vm323_vm0, %v320_v4, -inf  ;;  %v328_v9 = vmax.f32 %v324_v5, %v325_v6 }
  0x42   : > { %313 = vst [vmem:[%s1179_s27] sm:$0x1] %v1008_v0  ;;  %314 = vst [vmem:[%s1179_s27 + $0x1] sm:$0x1] %v1008_v0  ;;  %v329_v10 = vmax.f32 %v326_v7, %v327_v8  ;;  %v321_v11 = vld [vmem:[%s296_s26] sm:$0x1]  ;;  %s496_s24 = sand.u32 1, %s1070_s21  }
  0x43   : > { %315 = vst [vmem:[%s1179_s27 + $0x2] sm:$0x1] %v1008_v0  ;;  %316 = vst [vmem:[%s1179_s27 + $0x3] sm:$0x1] %v1008_v0  ;;  %v1195_v12 = vunpack.c.0.s8 %v321_v11  ;;  %s1245_s6 = sshll.u32 %s995_s18, 6  ;;  %s533_s7 = sshll.u32 %s1167_s12, 4  ;;  %s1260_s7 = int_to_ptr.vmem [resolvable:$true] %s533_s7 }
  0x44   : > { %v330_v13 = vmax.f32 %v328_v9, %v329_v10  ;;  %s550_s18 = sshll.u32 %s1179_s27, 4  ;;  %s1258_s10 = scalar_lea.hbm %s1411_s3, %s1245_s6  ;;  %s1271_s18 = int_to_ptr.vmem [resolvable:$true] %s550_s18 }
  0x45   : > { %vm352_vm1 = vcmp.eq.s32.totalorder %v1195_v12, 0  ;;  %vm378_vm2 = vcmp.eq.s32.totalorder %v1195_v12, 1  ;;  %vm404_vm3 = vcmp.eq.s32.totalorder %v1195_v12, 2  ;;  %vm430_vm4 = vcmp.eq.s32.totalorder %v1195_v12, 3  ;;  %s1269_s9 = scalar_lea.hbm %s1412_s4, %s1245_s6  ;;  %s1287_s8 = scalar_lea.hbm %s1410_s2, %s1245_s6 }
  0x46   : > { %v331_v14 = vsub.f32 %v317_v1, %v330_v13  ;;  %v332_v15 = vsub.f32 %v318_v2, %v330_v13  ;;  %v333_v16 = vsub.f32 %v319_v3, %v330_v13  ;;  %v334_v17 = vsub.f32 %v320_v4, %v330_v13  ;;  %s516_s5 = sshll.u32 %s1173_s13, 4  ;;  %s861_s14 = scalar_lea.vmem %s1260_s7, 64  ;;  %s1350_s5 = int_to_ptr.vmem [resolvable:$true] %s516_s5 }
  0x47   : > { %v725_v18 = vsel %vm352_vm1, 1.0, %v1008_v0  ;;  %v726_v19 = vsel %vm378_vm2, 1.0, %v1008_v0  ;;  %v727_v20 = vsel %vm404_vm3, 1.0, %v1008_v0  ;;  %v728_v21 = vsel %vm430_vm4, 1.0, %v1008_v0  ;;  %p862_p8 = scmp.ne.s32.totalorder %s1260_s7, %s861_s14  ;;  %p1421_p11 = scmp.ne.s32.totalorder %s1417_s28, 0 }
  0x48   : > { %v335_v22 = vmul.f32 1.442695, %v331_v14  ;;  %v337_v23 = vmul.f32 1.442695, %v332_v15  ;;  %v339_v24 = vmul.f32 1.442695, %v333_v16 }
  0x49   : > { %v341_v25 = vmul.f32 1.442695, %v334_v17  ;;  %v370_v26 = vsel %vm323_vm0, %v725_v18, 0.0  ;;  %v396_v27 = vsel %vm323_vm0, %v726_v19, 0.0  ;;  %v422_v28 = vsel %vm323_vm0, %v727_v20, 0.0  ;;  %p863_p0 = pnand %p862_p8, %p1421_p11 }
  0x4a   : > { %821 = vpow2.f32 %v335_v22  ;;  %v371_v29 = vrot.slane %v370_v26, 4  ;;  %v397_v30 = vrot.slane %v396_v27, 4  ;;  %v423_v31 = vrot.slane %v422_v28, 4  ;;  %v479_v48 = vld [vmem:[%s1179_s27] sm:$0x1] }
  0x4b   : > { %823 = vpow2.f32 %v337_v23  ;;  %v448_v32 = vsel %vm323_vm0, %v728_v21, 0.0  ;;  %v480_v49 = vld [vmem:[%s1179_s27 + $0x1] sm:$0x1]  ;;  %v481_v50 = vld [vmem:[%s1179_s27 + $0x2] sm:$0x1]  ;;  %p864_p6 = pneg %p863_p0 }
  0x4c   : > { %825 = vpow2.f32 %v339_v24  ;;  %v372_v33 = vadd.f32 %v371_v29, %v370_v26  ;;  %v398_v34 = vadd.f32 %v397_v30, %v396_v27  ;;  %v424_v35 = vadd.f32 %v423_v31, %v422_v28  ;;  %v482_v0 = vld [vmem:[%s1179_s27 + $0x3] sm:$0x1] }
  0x4d   : > { %827 = vpow2.f32 %v341_v25  ;;  %v449_v36 = vrot.slane %v448_v32, 4 }
  0x4e   : > { %v373_v37 = vrot.slane %v372_v33, 2  ;;  %v399_v38 = vrot.slane %v398_v34, 2  ;;  %v425_v39 = vrot.slane %v424_v35, 2 }
  0x4f   : > { %v450_v40 = vadd.f32 %v449_v36, %v448_v32 }
  0x50   : > { %v374_v41 = vadd.f32 %v373_v37, %v372_v33  ;;  %v400_v42 = vadd.f32 %v399_v38, %v398_v34  ;;  %v426_v43 = vadd.f32 %v425_v39, %v424_v35 }
  0x51   : > { %v451_v44 = vrot.slane %v450_v40, 2 }
  0x52   : > { %v375_v45 = vrot.slane %v374_v41, 1  ;;  %v401_v46 = vrot.slane %v400_v42, 1  ;;  %v427_v47 = vrot.slane %v426_v43, 1 }
  0x53   : > { %v452_v51 = vadd.f32 %v451_v44, %v450_v40 }
  0x54   : > { %v822_v52 = vpop.eup %821  ;;  %v376_v53 = vadd.f32 %v375_v45, %v374_v41  ;;  %v402_v54 = vadd.f32 %v401_v46, %v400_v42  ;;  %v428_v55 = vadd.f32 %v427_v47, %v426_v43  ;;  %v467_v46 = vld [vmem:[%s1167_s12] sm:$0x1]  ;;  %v468_v47 = vld [vmem:[%s1167_s12 + $0x1] sm:$0x1] }
  0x55   : > { %v824_v56 = vpop.eup %823  ;;  %v343_v57 = vsel %vm323_vm0, %v822_v52, 0.0  ;;  %v453_v58 = vrot.slane %v452_v51, 1 }
  0x56   : > { %v826_v59 = vpop.eup %825  ;;  %v344_v60 = vsel %vm323_vm0, %v824_v56, 0.0  ;;  %v483_v61 = vadd.f32 %v479_v48, %v376_v53  ;;  %v484_v62 = vadd.f32 %v480_v49, %v402_v54  ;;  %v485_v63 = vadd.f32 %v481_v50, %v428_v55  ;;  %v469_v55 = vld [vmem:[%s1167_s12 + $0x2] sm:$0x1] }
  0x57   : > { %v828_v1 = vpop.eup %827  ;;  %v345_v2 = vadd.f32 %v344_v60, %v343_v57  ;;  %v346_v3 = vsel %vm323_vm0, %v826_v59, 0.0  ;;  %v454_v4 = vadd.f32 %v453_v58, %v452_v51  ;;  %v470_v57 = vld [vmem:[%s1167_s12 + $0x3] sm:$0x1] }
  0x58   : > { %v348_v5 = vsel %vm323_vm0, %v828_v1, 0.0  ;;  %487 = vst [vmem:[%s1179_s27] sm:$0x1] %v483_v61  ;;  %488 = vst [vmem:[%s1179_s27 + $0x1] sm:$0x1] %v484_v62 }
  0x59   : > { %489 = vst [vmem:[%s1179_s27 + $0x2] sm:$0x1] %v485_v63  ;;  %v347_v6 = vadd.f32 %v346_v3, %v345_v2  ;;  %v486_v7 = vadd.f32 %v482_v0, %v454_v4 }
  0x5b   : > { %v349_v8 = vadd.f32 %v348_v5, %v347_v6  ;;  %490 = vst [vmem:[%s1179_s27 + $0x3] sm:$0x1] %v486_v7  ;;  %s1292_s27 = scalar_lea.sflag [#allocation7], %s496_s24 }
  0x5d   : > { %829 = vrcp.f32 %v349_v8 }
  0x67   : > { %v830_v9 = vpop.eup %829 }
  0x68   : > { %v351_v10 = vmul.f32 %v830_v9, %v822_v52  ;;  %v377_v11 = vmul.f32 %v830_v9, %v824_v56  ;;  %v403_v13 = vmul.f32 %v830_v9, %v826_v59  ;;  %v429_v14 = vmul.f32 %v830_v9, %v828_v1 }
  0x6a   : > { %v361_v15 = vsel %vm323_vm0, %v351_v10, 0.0  ;;  %v387_v16 = vsel %vm323_vm0, %v377_v11, 0.0  ;;  %v413_v17 = vsel %vm323_vm0, %v403_v13, 0.0  ;;  %v439_v18 = vsel %vm323_vm0, %v429_v14, 0.0 }
  0x6b   : > { %v362_v19 = vrot.slane %v361_v15, 4  ;;  %v388_v20 = vrot.slane %v387_v16, 4  ;;  %v414_v21 = vrot.slane %v413_v17, 4  ;;  %v440_v22 = vrot.slane %v439_v18, 4 }
  0x6c   : > { %v353_v23 = vsel %vm352_vm1, %v351_v10, 0.0  ;;  %v379_v24 = vsel %vm378_vm2, %v377_v11, 0.0  ;;  %v405_v25 = vsel %vm404_vm3, %v403_v13, 0.0  ;;  %v431_v26 = vsel %vm430_vm4, %v429_v14, 0.0  ;;  %v1252_v10 = vld [vmem:[%s1173_s13] sm:$0x1] }
  0x6d   : > { %v363_v27 = vadd.f32 %v362_v19, %v361_v15  ;;  %v389_v28 = vadd.f32 %v388_v20, %v387_v16  ;;  %v415_v29 = vadd.f32 %v414_v21, %v413_v17  ;;  %v441_v30 = vadd.f32 %v440_v22, %v439_v18  ;;  %v1263_v14 = vld [vmem:[%s1173_s13 + $0x1] sm:$0x1]  ;;  %v1278_v17 = vld [vmem:[%s1173_s13 + $0x2] sm:$0x1]  ;;  %v1281_v18 = vld [vmem:[%s1173_s13 + $0x3] sm:$0x1] }
  0x6e   : > { %v354_v31 = vsel %vm323_vm0, %v353_v23, 0.0  ;;  %v380_v32 = vsel %vm323_vm0, %v379_v24, 0.0  ;;  %v406_v33 = vsel %vm323_vm0, %v405_v25, 0.0  ;;  %v432_v34 = vsel %vm323_vm0, %v431_v26, 0.0 }
  0x6f   : > { %v364_v35 = vrot.slane %v363_v27, 2  ;;  %v390_v36 = vrot.slane %v389_v28, 2  ;;  %v416_v37 = vrot.slane %v415_v29, 2  ;;  %v442_v12 = vrot.slane %v441_v30, 2 }
  0x70   : > { %v355_v38 = vrot.slane %v354_v31, 4  ;;  %v381_v39 = vrot.slane %v380_v32, 4  ;;  %v407_v40 = vrot.slane %v406_v33, 4  ;;  %v433_v41 = vrot.slane %v432_v34, 4 }
  0x71   : > { %v365_v42 = vadd.f32 %v364_v35, %v363_v27  ;;  %v391_v43 = vadd.f32 %v390_v36, %v389_v28  ;;  %v417_v44 = vadd.f32 %v416_v37, %v415_v29  ;;  %v443_v45 = vadd.f32 %v442_v12, %v441_v30 }
  0x72   : > { %v356_v48 = vadd.f32 %v355_v38, %v354_v31  ;;  %v382_v49 = vadd.f32 %v381_v39, %v380_v32  ;;  %v408_v50 = vadd.f32 %v407_v40, %v406_v33  ;;  %v434_v51 = vadd.f32 %v433_v41, %v432_v34 }
  0x73   : > { %v366_v52 = vrot.slane %v365_v42, 1  ;;  %v392_v53 = vrot.slane %v391_v43, 1  ;;  %v418_v54 = vrot.slane %v417_v44, 1  ;;  %v444_v56 = vrot.slane %v443_v45, 1 }
  0x74   : > { %v357_v58 = vrot.slane %v356_v48, 2  ;;  %v383_v59 = vrot.slane %v382_v49, 2  ;;  %v409_v60 = vrot.slane %v408_v50, 2  ;;  %v435_v61 = vrot.slane %v434_v51, 2 }
  0x75   : > { %v367_v62 = vadd.f32 %v366_v52, %v365_v42  ;;  %v393_v63 = vadd.f32 %v392_v53, %v391_v43  ;;  %v419_v0 = vadd.f32 %v418_v54, %v417_v44  ;;  %v445_v1 = vadd.f32 %v444_v56, %v443_v45 }
  0x76   : > { %v358_v2 = vadd.f32 %v357_v58, %v356_v48  ;;  %v384_v3 = vadd.f32 %v383_v59, %v382_v49  ;;  %v410_v4 = vadd.f32 %v409_v60, %v408_v50  ;;  %v436_v5 = vadd.f32 %v435_v61, %v434_v51 }
  0x77   : > { %v471_v6 = vadd.f32 %v467_v46, %v367_v62  ;;  %v472_v7 = vadd.f32 %v468_v47, %v393_v63  ;;  %v473_v8 = vadd.f32 %v469_v55, %v419_v0  ;;  %v474_v9 = vadd.f32 %v470_v57, %v445_v1 }
  0x78   : > { %v359_v11 = vrot.slane %v358_v2, 1  ;;  %v385_v13 = vrot.slane %v384_v3, 1  ;;  %v411_v15 = vrot.slane %v410_v4, 1  ;;  %v437_v16 = vrot.slane %v436_v5, 1 }
  0x79   : > { %475 = vst [vmem:[%s1167_s12] sm:$0x1] %v471_v6  ;;  %476 = vst [vmem:[%s1167_s12 + $0x1] sm:$0x1] %v472_v7 }
  0x7a   : > { %477 = vst [vmem:[%s1167_s12 + $0x2] sm:$0x1] %v473_v8  ;;  %478 = vst [vmem:[%s1167_s12 + $0x3] sm:$0x1] %v474_v9  ;;  %v360_v19 = vadd.f32 %v359_v11, %v358_v2  ;;  %v386_v20 = vadd.f32 %v385_v13, %v384_v3  ;;  %v412_v21 = vadd.f32 %v411_v15, %v410_v4  ;;  %s1009_s12 = smov [#allocation6]  }
  0x7b   : > { %v438_v22 = vadd.f32 %v437_v16, %v436_v5  ;;  %s865_s22 = sshll.u32 %s1009_s12, 4  ;;  %s866_s22 = int_to_ptr.vmem [resolvable:$false] %s865_s22 }
  0x7c   : > { %s867_s11 = scalar_lea.vmem %s866_s22, 128  ;;  %p868_p13 = scmp.lt.s32.totalorder %s1260_s7, %s866_s22 }
  0x7d   : > { %p869_p2 = scmp.lt.s32.totalorder %s867_s11, %s861_s14 }
  0x7f   : > { %p870_p5 = por %p869_p2, %p868_p13 }
  0x81   : > { %p871_p4 = pnand %p870_p5, %p864_p6 }
  0x83   : > { %874 = shalt.err (!%p871_p4)
}
  0x84   : > { %s875_s21 = scalar_lea.hbm %s1258_s10, 64  ;;  %s879_s26 = scalar_lea.hbm %s1411_s3, 128 }
  0x85   : > { %p876_p7 = scmp.ne.s32.totalorder %s1258_s10, %s875_s21  ;;  %p880_p1 = scmp.lt.u32.totalorder %s1258_s10, %s1411_s3 }
  0x86   : > { %p881_p3 = scmp.lt.u32.totalorder %s879_s26, %s875_s21  ;;  %p883_p8 = scmp.lt.u32.totalorder %s875_s21, %s1258_s10 }
  0x87   : > { %p877_p10 = pnand %p876_p7, %p1421_p11 }
  0x88   : > { %p882_p9 = por %p881_p3, %p880_p1 }
  0x89   : > { %p878_p12 = pneg %p877_p10 }
  0x8a   : > { %p884_p0 = por %p883_p8, %p882_p9 }
  0x8c   : > { %p885_p6 = pnand %p884_p0, %p878_p12 }
  0x8e   : > { %888 = shalt.err (!%p885_p6)
}
  0x8f   : > { %s1010_s14 = smov 16   ;;  %s1011_s11 = smov 1  }
  0x90   : > { %747 = dma.vmem_to_hbm [thread:$0]  (%p1421_p11), %s1260_s7, 64, %s1258_s10, %s1292_s27, %s1010_s14, %s1010_s14, %s1011_s11  }
  0x91   : > { %s889_s24 = scalar_lea.vmem %s1271_s18, 64  ;;  %s1012_s21 = smov [#allocation8]  }
  0x92   : > { %p890_p13 = scmp.ne.s32.totalorder %s1271_s18, %s889_s24  ;;  %s893_s6 = sshll.u32 %s1012_s21, 4  ;;  %s894_s6 = int_to_ptr.vmem [resolvable:$false] %s893_s6 }
  0x93   : > { %s895_s26 = scalar_lea.vmem %s894_s6, 128  ;;  %p896_p4 = scmp.lt.s32.totalorder %s1271_s18, %s894_s6 }
  0x94   : > { %p891_p2 = pnand %p890_p13, %p1421_p11  ;;  %p897_p7 = scmp.lt.s32.totalorder %s895_s26, %s889_s24 }
  0x96   : > { %p892_p5 = pneg %p891_p2  ;;  %p898_p10 = por %p897_p7, %p896_p4 }
  0x98   : > { %p899_p12 = pnand %p898_p10, %p892_p5 }
  0x9a   : > { %902 = shalt.err (!%p899_p12)
}
  0x9b   : > { %s903_s7 = scalar_lea.hbm %s1269_s9, 64  ;;  %s907_s22 = scalar_lea.hbm %s1412_s4, 128 }
  0x9c   : > { %p904_p1 = scmp.ne.s32.totalorder %s1269_s9, %s903_s7  ;;  %p908_p8 = scmp.lt.u32.totalorder %s1269_s9, %s1412_s4 }
  0x9d   : > { %p909_p0 = scmp.lt.u32.totalorder %s907_s22, %s903_s7  ;;  %p911_p13 = scmp.lt.u32.totalorder %s903_s7, %s1269_s9 }
  0x9e   : > { %p905_p3 = pnand %p904_p1, %p1421_p11 }
  0x9f   : > { %p910_p6 = por %p909_p0, %p908_p8 }
  0xa0   : > { %p906_p9 = pneg %p905_p3 }
  0xa1   : > { %p912_p2 = por %p911_p13, %p910_p6 }
  0xa3   : > { %p913_p5 = pnand %p912_p2, %p906_p9 }
  0xa5   : > { %916 = shalt.err (!%p913_p5)
}
  0xa6   : > { %748 = dma.vmem_to_hbm [thread:$0]  (%p1421_p11), %s1271_s18, 64, %s1269_s9, %s1292_s27, %s1010_s14, %s1010_s14, %s1011_s11   ;;  %v459_v23 = vadd.f32 %v1252_v10, %v360_v19  ;;  %v460_v24 = vadd.f32 %v1263_v14, %v386_v20  ;;  %v461_v25 = vadd.f32 %v1278_v17, %v412_v21  ;;  %v462_v26 = vadd.f32 %v1281_v18, %v438_v22 }
  0xa7   : > { %s492_s24 = scalar_lea.sflag [#allocation4], %s1157_s25  ;;  %s917_s18 = scalar_lea.vmem %s1350_s5, 64 }
  0xa8   : > { %463 = vst [vmem:[%s1173_s13] sm:$0x1] %v459_v23  ;;  %464 = vst [vmem:[%s1173_s13 + $0x1] sm:$0x1] %v460_v24  ;;  %p918_p4 = scmp.ne.s32.totalorder %s1350_s5, %s917_s18  ;;  %s1013_s9 = smov [#allocation5]  }
  0xa9   : > { %465 = vst [vmem:[%s1173_s13 + $0x2] sm:$0x1] %v461_v25  ;;  %466 = vst [vmem:[%s1173_s13 + $0x3] sm:$0x1] %v462_v26  ;;  %s921_s27 = sshll.u32 %s1013_s9, 4  ;;  %s922_s27 = int_to_ptr.vmem [resolvable:$false] %s921_s27 }
  0xaa   : > { %p919_p7 = pnand %p918_p4, %p1421_p11  ;;  %s923_s26 = scalar_lea.vmem %s922_s27, 128 }
  0xab   : > { %p924_p12 = scmp.lt.s32.totalorder %s1350_s5, %s922_s27  ;;  %p925_p1 = scmp.lt.s32.totalorder %s923_s26, %s917_s18 }
  0xac   : > { %p920_p10 = pneg %p919_p7 }
  0xad   : > { %p926_p3 = por %p925_p1, %p924_p12 }
  0xaf   : > { %p927_p9 = pnand %p926_p3, %p920_p10 }
  0xb1   : > { %930 = shalt.err (!%p927_p9)
}
  0xb2   : > { %s931_s13 = scalar_lea.hbm %s1287_s8, 64  ;;  %s935_s12 = scalar_lea.hbm %s1410_s2, 128 }
  0xb3   : > { %p932_p8 = scmp.ne.s32.totalorder %s1287_s8, %s931_s13  ;;  %p936_p13 = scmp.lt.u32.totalorder %s1287_s8, %s1410_s2 }
  0xb4   : > { %p937_p2 = scmp.lt.u32.totalorder %s935_s12, %s931_s13  ;;  %p939_p4 = scmp.lt.u32.totalorder %s931_s13, %s1287_s8 }
  0xb5   : > { %p933_p0 = pnand %p932_p8, %p1421_p11 }
  0xb6   : > { %p938_p5 = por %p937_p2, %p936_p13 }
  0xb7   : > { %p934_p6 = pneg %p933_p0 }
  0xb8   : > { %p940_p7 = por %p939_p4, %p938_p5 }
  0xba   : > { %p941_p10 = pnand %p940_p7, %p934_p6 }
  0xbc   : > { %944 = shalt.err (!%p941_p10)
}
  0xbd   : > { %746 = dma.vmem_to_hbm [thread:$0]  (%p1421_p11), %s1350_s5, 64, %s1287_s8, %s492_s24, %s1010_s14, %s1010_s14, %s1011_s11  }
  0xbe PF: > { %s565_s6 = sand.u32 1, %s983_s15   ;;  %p1422_p12 = scmp.ne.s32.totalorder %s1418_s30, 0 }
  0xbf   : > { %p1423_p1 = scmp.ge.s32.totalorder %s1003_s20, 2  ;;  %s566_s18 = scalar_lea.sflag [#allocation4], %s565_s6 }
  0xc1   : > { %p757_p3 = pnand %p1423_p1, %p1422_p12 }
  0xc3   : > { %974 = dma.done.wait (!%p757_p3), %s566_s18, 64  }
  0xc4   : > { %976 = vsyncadd (!%p757_p3), %s566_s18, 4294967232  ;;  %s1424_s28 = sadd.s32 4294967294, %s1003_s20  }
  0xc5   : > { %s574_s9 = sand.u32 1, %s1424_s28  }
  0xc6   : > { %s575_s27 = scalar_lea.sflag [#allocation7], %s574_s9 }
  0xc7   : > { %978 = dma.done.wait (!%p757_p3), %s575_s27, 128  }
  0xc8   : > { %980 = vsyncadd (!%p757_p3), %s575_s27, 4294967168  ;;  %s24_s20 = sadd.s32 1, %s1003_s20   ;;  %s1425_s15 = smov %s987_s16 }
  0xc9   : > { %p21_p11 = scmp.ge.s32.totalorder %s24_s20, 4   ;;  %s1426_s16 = smov %s991_s17 }
  0xca   : > { %s1427_s17 = smov %s1101_s29  ;;  %s1428_s18 = smov %s999_s19 }
  0xcb   : > { %s1429_s19 = smov %s1431_s23  ;;  %23 = sbr.rel (!%p21_p11) target bundleno = 8 (0x8), region = 112 }
  0xd2   :  { %589 = vsyncpa [#allocation3], 1 }
  0xd3   :  { %591 = vsyncpa [#allocation3 + $0x1], 1 }
  0xd4   :  { %592 = vsyncpa [#allocation4], 1 }
  0xd5   :  { %594 = vsyncpa [#allocation4 + $0x1], 1 }
  0xd6   :  { %595 = vsyncpa [#allocation7], 1 }
  0xd7   :  { %597 = vsyncpa [#allocation7 + $0x1], 1 }

</bundles_post_ra>
